<compile_context>
chip_gen: v5e
topology: v5e:2x2
jax: 0.10.0
libtpu: 0.0.40
codegen_flags: <defaults>
</compile_context>

<pallas_src>
import functools

import jax
import jax.numpy as jnp
from jax.experimental import pallas as pl
from jax.experimental.pallas import tpu as pltpu

N_EMBD = 50
DROPOUT = 0.2  # unused at inference time (identity)

LANE = 128   # lane width
SUBLANE = 8  # f32 sublane height


def _round_up(n, m):
    return ((n + m - 1) // m) * m


def _ffn_kernel(x_ref, w1_ref, b1_ref, w2_ref, b2_ref, o_ref):
    # x_ref:  (TM, C)      f32   -- activations streamed straight from HBM
    # w1_ref: (C, H_pad)   operand dtype (bf16 default), VMEM-resident
    # b1_ref: (1, H_pad)   f32,  VMEM-resident
    # w2_ref: (H_pad, C)   operand dtype, VMEM-resident
    # b2_ref: (1, C)       f32,  VMEM-resident
    # o_ref:  (TM, C)      f32
    x = x_ref[...].astype(w1_ref.dtype)  # in-kernel cast; no extra HBM pass
    # First matmul on the MXU with f32 accumulation.
    h = jnp.dot(x, w1_ref[...], preferred_element_type=jnp.float32)
    # Bias add + ReLU in f32 on the accumulator (VPU).
    h = jnp.maximum(h + b1_ref[...], 0.0)
    # Second matmul; cast intermediate to the weight operand dtype.
    y = jnp.dot(h.astype(w2_ref.dtype), w2_ref[...],
                preferred_element_type=jnp.float32)
    y = y + b2_ref[...]
    # Dropout (eval mode) == identity.
    o_ref[...] = y.astype(o_ref.dtype)


@functools.partial(jax.jit, static_argnames=("tm", "operand_dtype"))
def feed_forward(x, w1, b1, w2, b2, *, tm=4096, operand_dtype=jnp.bfloat16):
    """x: (B, T, C) float32. w1: (C, 4C), b1: (4C,), w2: (4C, C), b2: (C,).

    Returns (B, T, C) in x.dtype. Eval-mode (dropout = identity).
    bf16 MXU operands (f32 accumulate) are the fast path on v5e/v6e/v7x alike;
    use operand_dtype=jnp.float32 only for exact-math testing.
    """
    B, T, C = x.shape
    H = w1.shape[1]
    M = B * T

    # Pad only the (tiny) hidden dim of the weights/biases so both MXU
    # contractions and the intermediate are lane-aligned. Zero padding is
    # exact: padded hidden units are 0 after ReLU and multiply zero w2 rows.
    H_pad = _round_up(H, LANE)            # 200 -> 256

    # Row tile: as large as possible (amortize ~0.35 us/step overhead + get
    # long DMAs), but keep >= 2 grid steps when M allows so v7x's two
    # TensorCores both get work on the "parallel" axis.
    TM = min(tm, _round_up(M, SUBLANE))
    if M > SUBLANE:
        TM = min(TM, _round_up(-(-M // 2), SUBLANE))
    TM = max(SUBLANE, _round_up(TM, SUBLANE))
    M_pad = _round_up(M, TM)
    n_tiles = M_pad // TM

    # Activations: reshape only (free); pad rows only if the grid requires it.
    x2 = x.reshape(M, C)
    if M_pad != M:
        x2 = jnp.pad(x2, ((0, M_pad - M), (0, 0)))

    w1_p = jnp.pad(w1, ((0, 0), (0, H_pad - H))).astype(operand_dtype)
    w2_p = jnp.pad(w2, ((0, H_pad - H), (0, 0))).astype(operand_dtype)
    b1_p = jnp.pad(b1, (0, H_pad - H)).reshape(1, H_pad).astype(jnp.float32)
    b2_p = b2.reshape(1, C).astype(jnp.float32)

    # Advisory cost estimate (real, unpadded work; activations dominate bytes).
    w_itemsize = jnp.dtype(operand_dtype).itemsize
    flops = 4 * M * C * H
    bytes_accessed = (M_pad * C * 4            # x read (f32)
                      + M_pad * C * 4          # out write (f32)
                      + (w1_p.size + w2_p.size) * w_itemsize
                      + (b1_p.size + b2_p.size) * 4)

    out = pl.pallas_call(
        _ffn_kernel,
        out_shape=jax.ShapeDtypeStruct((M_pad, C), x.dtype),
        grid_spec=pltpu.PrefetchScalarGridSpec(
            num_scalar_prefetch=0,
            grid=(n_tiles,),
            in_specs=[
                pl.BlockSpec((TM, C), lambda i: (i, 0)),      # x tile (full C)
                pl.BlockSpec((C, H_pad), lambda i: (0, 0)),   # w1 resident
                pl.BlockSpec((1, H_pad), lambda i: (0, 0)),   # b1 resident
                pl.BlockSpec((H_pad, C), lambda i: (0, 0)),   # w2 resident
                pl.BlockSpec((1, C), lambda i: (0, 0)),       # b2 resident
            ],
            out_specs=pl.BlockSpec((TM, C), lambda i: (i, 0)),
        ),
        compiler_params=pltpu.CompilerParams(
            dimension_semantics=("parallel",)),
        cost_estimate=pl.CostEstimate(
            flops=flops, transcendentals=0, bytes_accessed=bytes_accessed),
    )(x2, w1_p, b1_p, w2_p, b2_p)

    if M_pad != M:
        out = out[:M]
    return out.reshape(B, T, C)


def init_params(key, n_embd):
    """Deterministic init mirroring PyTorch nn.Linear default U(-1/sqrt(fan_in), +)."""
    k1, k2, k3, k4 = jax.random.split(key, 4)
    hid = 4 * n_embd
    lim1 = 1.0 / jnp.sqrt(jnp.float32(n_embd))
    lim2 = 1.0 / jnp.sqrt(jnp.float32(hid))
    # stored as (in_features, out_features) for y = x @ W + b
    w1 = jax.random.uniform(k1, (n_embd, hid), jnp.float32, -lim1, lim1)
    b1 = jax.random.uniform(k2, (hid,), jnp.float32, -lim1, lim1)
    w2 = jax.random.uniform(k3, (hid, n_embd), jnp.float32, -lim2, lim2)
    b2 = jax.random.uniform(k4, (n_embd,), jnp.float32, -lim2, lim2)
    return w1, b1, w2, b2


if __name__ == "__main__":
    key = jax.random.PRNGKey(0)
    kx, kp = jax.random.split(key)

    B, T, C = 2, 8, N_EMBD
    x = jax.random.normal(kx, (B, T, C), jnp.float32)
    w1, b1, w2, b2 = init_params(kp, C)

    # plain-JAX reference (eval mode: dropout = identity)
    ref = jnp.maximum(x.reshape(-1, C) @ w1 + b1, 0.0) @ w2 + b2
    ref = ref.reshape(B, T, C)

    # 1) exact-math path (f32 MXU operands) -- tight tolerance
    y_f32 = feed_forward(x, w1, b1, w2, b2, operand_dtype=jnp.float32)
    y_f32 = jax.block_until_ready(y_f32)
    assert y_f32.shape == (B, T, C)
    assert jnp.allclose(y_f32, ref, atol=1e-4, rtol=1e-4)

    # 2) fast path (bf16 MXU operands, f32 accumulate) -- loose tolerance
    y_bf16 = feed_forward(x, w1, b1, w2, b2, operand_dtype=jnp.bfloat16)
    y_bf16 = jax.block_until_ready(y_bf16)
    assert y_bf16.shape == (B, T, C)
    assert jnp.allclose(y_bf16, ref, atol=5e-2, rtol=5e-2)

    print("KERNEL_OK")
</pallas_src>

<mosaic_0001>
module attributes {stable_mosaic.version = 11 : i64} {
  func.func @_ffn_kernel(%arg0: i32, %arg1: memref<8x50xf32, #tpu.memory_space<vmem>>, %arg2: memref<50x256xf32, #tpu.memory_space<vmem>>, %arg3: memref<1x256xf32, #tpu.memory_space<vmem>>, %arg4: memref<256x50xf32, #tpu.memory_space<vmem>>, %arg5: memref<1x50xf32, #tpu.memory_space<vmem>>, %arg6: memref<8x50xf32, #tpu.memory_space<vmem>>) attributes {dimension_semantics = [#tpu.dimension_semantics<parallel>], iteration_bounds = array<i64: 2>, scalar_prefetch = 0 : i64, scratch_operands = 0 : i64, tpu.core_type = #tpu.core_type<tc>, window_params = [{transform_indices = @transform_0, window_bounds = array<i64: 8, 50>}, {pipeline_mode = #tpu.pipeline_mode<synchronous>, transform_indices = @transform_1, window_bounds = array<i64: 50, 256>}, {pipeline_mode = #tpu.pipeline_mode<synchronous>, transform_indices = @transform_2, window_bounds = array<i64: 1, 256>}, {pipeline_mode = #tpu.pipeline_mode<synchronous>, transform_indices = @transform_3, window_bounds = array<i64: 256, 50>}, {pipeline_mode = #tpu.pipeline_mode<synchronous>, transform_indices = @transform_4, window_bounds = array<i64: 1, 50>}, {transform_indices = @transform_5, window_bounds = array<i64: 8, 50>}]} {
    %c0 = arith.constant 0 : index
    %c0_0 = arith.constant 0 : index
    %0 = vector.load %arg1[%c0, %c0_0] : memref<8x50xf32, #tpu.memory_space<vmem>>, vector<8x50xf32>
    %c0_1 = arith.constant 0 : index
    %c0_2 = arith.constant 0 : index
    %1 = vector.load %arg2[%c0_1, %c0_2] : memref<50x256xf32, #tpu.memory_space<vmem>>, vector<50x256xf32>
    %cst = arith.constant dense<0.000000e+00> : vector<8x256xf32>
    %2 = tpu.matmul %0, %1, %cst {dimension_numbers = #tpu.dot_dimension_numbers<[1], [0], [0], [1], [0, 0, 1, 1], [], []>} : vector<8x50xf32>, vector<50x256xf32>, vector<8x256xf32> -> vector<8x256xf32>
    %c0_3 = arith.constant 0 : index
    %c0_4 = arith.constant 0 : index
    %3 = vector.load %arg3[%c0_3, %c0_4] : memref<1x256xf32, #tpu.memory_space<vmem>>, vector<1x256xf32>
    %4 = vector.broadcast %3 : vector<1x256xf32> to vector<8x256xf32>
    %5 = arith.addf %2, %4 : vector<8x256xf32>
    %cst_5 = arith.constant 0.000000e+00 : f32
    %6 = vector.broadcast %cst_5 : f32 to vector<8x256xf32>
    %7 = arith.maximumf %5, %6 : vector<8x256xf32>
    %c0_6 = arith.constant 0 : index
    %c0_7 = arith.constant 0 : index
    %8 = vector.load %arg4[%c0_6, %c0_7] : memref<256x50xf32, #tpu.memory_space<vmem>>, vector<256x50xf32>
    %cst_8 = arith.constant dense<0.000000e+00> : vector<8x50xf32>
    %9 = tpu.matmul %7, %8, %cst_8 {dimension_numbers = #tpu.dot_dimension_numbers<[1], [0], [0], [1], [0, 0, 1, 1], [], []>} : vector<8x256xf32>, vector<256x50xf32>, vector<8x50xf32> -> vector<8x50xf32>
    %c0_9 = arith.constant 0 : index
    %c0_10 = arith.constant 0 : index
    %10 = vector.load %arg5[%c0_9, %c0_10] : memref<1x50xf32, #tpu.memory_space<vmem>>, vector<1x50xf32>
    %11 = vector.broadcast %10 : vector<1x50xf32> to vector<8x50xf32>
    %12 = arith.addf %9, %11 : vector<8x50xf32>
    %c0_11 = arith.constant 0 : index
    %c0_12 = arith.constant 0 : index
    %13 = vector.load %arg6[%c0_11, %c0_12] : memref<8x50xf32, #tpu.memory_space<vmem>>, vector<8x50xf32>
    tpu.vector_store %arg6[%c0_11, %c0_12], %12 {strides = array<i32>} : memref<8x50xf32, #tpu.memory_space<vmem>>, vector<8x50xf32>,
    return
  }
  func.func @transform_0(%arg0: i32) -> (i32, i32) {
    %c0_i32 = arith.constant 0 : i32
    %c0_i32_0 = arith.constant 0 : i32
    return %arg0, %c0_i32 : i32, i32
  }
  func.func @transform_1(%arg0: i32) -> (i32, i32) {
    %c0_i32 = arith.constant 0 : i32
    %c0_i32_0 = arith.constant 0 : i32
    %c0_i32_1 = arith.constant 0 : i32
    return %c0_i32, %c0_i32_0 : i32, i32
  }
  func.func @transform_2(%arg0: i32) -> (i32, i32) {
    %c0_i32 = arith.constant 0 : i32
    %c0_i32_0 = arith.constant 0 : i32
    %c0_i32_1 = arith.constant 0 : i32
    return %c0_i32, %c0_i32_0 : i32, i32
  }
  func.func @transform_3(%arg0: i32) -> (i32, i32) {
    %c0_i32 = arith.constant 0 : i32
    %c0_i32_0 = arith.constant 0 : i32
    %c0_i32_1 = arith.constant 0 : i32
    return %c0_i32, %c0_i32_0 : i32, i32
  }
  func.func @transform_4(%arg0: i32) -> (i32, i32) {
    %c0_i32 = arith.constant 0 : i32
    %c0_i32_0 = arith.constant 0 : i32
    %c0_i32_1 = arith.constant 0 : i32
    return %c0_i32, %c0_i32_0 : i32, i32
  }
  func.func @transform_5(%arg0: i32) -> (i32, i32) {
    %c0_i32 = arith.constant 0 : i32
    %c0_i32_0 = arith.constant 0 : i32
    return %arg0, %c0_i32 : i32, i32
  }
}

</mosaic_0001>

<bundles_post_ra>
// kernel: feed_forward.1
= control target key start
LH: loop header
LB: loop body
LE: loop exit
PB: predicated region body
PF: predicated region fallthrough
CT: control target
= control target key end

     0   :  { %10 = vsyncpa [#allocation3], 0  ;;  %s826_s0 = inlined_call_operand.vmem [shape: f32[16,50], index: 0, kind: input, shape index: {}]   ;;  %s827_s1 = inlined_call_operand.vmem [shape: f32[50,256], index: 1, kind: input, shape index: {}]   ;;  %s828_s2 = inlined_call_operand.vmem [shape: f32[1,256], index: 2, kind: input, shape index: {}]   ;;  %s829_s3 = inlined_call_operand.vmem [shape: f32[256,50], index: 3, kind: input, shape index: {}]   ;;  %s830_s4 = inlined_call_operand.vmem [shape: f32[1,50], index: 4, kind: input, shape index: {}]   ;;  %s831_s5 = inlined_call_operand.hbm [shape: f32[16,50], index: 5, kind: output, shape index: {}]  }
   0x1   :  { %12 = vsyncpa [#allocation3 + $0x1], 0  ;;  %s594_s18 = smov 0   ;;  %s596_s19 = smov 0  }
   0x2   :  { %s598_s20 = smov 0   ;;  %s600_s21 = smov 0  }
   0x3 LB: > { %s615_s22 = sadd.s32 4294967295, %s562_s21   ;;  %s446_s23 = sadd.s32 4294967294, %s562_s21   ;;  %s562_s21 = sphi %s600_s21, %s837_s21   ;;  %s558_s20 = sphi %s598_s20, %s836_s20   ;;  %s554_s19 = sphi %s596_s19, %s835_s19   ;;  %s550_s18 = sphi %s594_s18, %s834_s18  }
   0x4   : > { %s619_s24 = sadd.s32 1, %s562_s21   ;;  %s135_s25 = sadd.s32 1, %s558_s20 }
   0x5   : > { %s132_s26 = ssub.s32 %s562_s21, %s619_s24  ;;  %p145_p0 = scmp.ne.s32.totalorder %s558_s20, %s554_s19 }
   0x6   : > { %p133_p1 = scmp.eq.s32.totalorder %s132_s26, 0  ;;  %p146_p2 = scmp.eq.s32.totalorder %s615_s22, 1 }
   0x7   : > { %p151_p3 = scmp.ne.s32.totalorder %s554_s19, %s550_s18  ;;  %p152_p4 = scmp.eq.s32.totalorder %s446_s23, 1 }
   0x8   : > { %s630_s27 = scalar_select %p133_p1, %s558_s20, %s135_s25  }
   0x9   : > { %p632_p5 = por %p146_p2, %p145_p0  ;;  %p636_p6 = por %p152_p4, %p151_p3 }
   0xa   : > { %p449_p7 = scmp.ge.s32.totalorder %s562_s21, 1  ;;  %p189_p8 = scmp.lt.s32.totalorder %s562_s21, 3 }
   0xc   : > { %p190_p9 = pnand %p449_p7, %p189_p8 }
   0xd   : > { %p216_p10 = scmp.lt.s32.totalorder (!%p190_p9), %s615_s22, 1  ;;  %s213_s9 = sand.u32 (!%p190_p9), 1, %s554_s19  }
   0xe   : > { %193 = sbr.rel (%p190_p9) target bundleno = 302 (0x12e), region = 40  ;;  %s450_s10 = sshll.u32 (!%p190_p9), %s213_s9, 3 }
   0xf   : > { %s457_s11 = sshll.u32 (!%p190_p9), %s615_s22, 3  ;;  %s215_s23 = scalar_lea.vmem (!%p190_p9), [#allocation2], %s450_s10 }
  0x10   : > { %s382_s16 = scalar_lea.hbm (!%p190_p9), %s831_s5, %s457_s11  ;;  %s520_s7 = scalar_lea.hbm (!%p190_p9), %s831_s5, 16 }
  0x11   : > { %s386_s25 = sshll.u32 (!%p190_p9), %s382_s16, 4  ;;  %s387_s25 = int_to_ptr.hbm [resolvable:$true] %s386_s25 }
  0x12   : > { %s514_s26 = sshra.s32 (!%p190_p9), %s387_s25, 4  ;;  %s515_s26 = int_to_ptr.hbm [resolvable:$true] %s514_s26 }
  0x13   : > { %v233_v0 = vld [vmem:[%s827_s1 + $0x60] sm:$0x3]  ;;  %vm245_vm0 = vcmask 1041408   ;;  %v231_v1 = vld [vmem:[%s827_s1 + $0x50] sm:$0xff]  ;;  %v234_v2 = vld [vmem:[%s827_s1 + $0x68] sm:$0x3]  ;;  %p521_p0 = scmp.lt.s32.totalorder %s515_s26, %s831_s5 }
  0x14   : > { %452 = vmatpush.msk.msra.mxu0 %vm245_vm0, %v233_v0  ;;  %454 = vmatpush.msk.msra.mxu1 %vm245_vm0, %v234_v2  ;;  %v232_v3 = vld [vmem:[%s827_s1 + $0x58] sm:$0xff]  ;;  %v229_v4 = vld [vmem:[%s827_s1 + $0x40] sm:$0xff]  ;;  %v230_v5 = vld [vmem:[%s827_s1 + $0x48] sm:$0xff]  ;;  %s217_s17 = scalar_select %p216_p10, %s615_s22, 1  ;;  %vm241_vm1 = vcmask 408576  }
  0x15   : > { %v227_v6 = vld [vmem:[%s827_s1 + $0x30] sm:$0xff]  ;;  %v228_v7 = vld [vmem:[%s827_s1 + $0x38] sm:$0xff]  ;;  %v225_v11 = vld [vmem:[%s827_s1 + $0x20] sm:$0xff]  ;;  %s372_s22 = scalar_lea.sflag [#allocation3], %s213_s9  ;;  %s516_s30 = scalar_lea.hbm %s515_s26, 8 }
  0x16   : > { %262 = vmatpush.msra.mxu0 %v231_v1  ;;  %282 = vmatpush.msra.mxu1 %v232_v3  ;;  %v309_v8 = vld [vmem:[%s829_s3 + $0x78] sm:$0xff]  ;;  %s451_s8 = sshll.u32 %s217_s17, 3  ;;  %v308_v9 = vld [vmem:[%s829_s3 + $0x70] sm:$0xff]  ;;  %v226_v12 = vld [vmem:[%s827_s1 + $0x28] sm:$0xff]  ;;  %s384_s17 = sshll.u32 %s215_s23, 4  ;;  %s385_s17 = int_to_ptr.vmem [resolvable:$true] %s384_s17 }
  0x17   : > { %v325_v10 = vld [vmem:[%s829_s3 + $0xf8] sm:$0xff]  ;;  %330 = vmatpush.msra.mxu2 %v309_v8  ;;  %v324_v13 = vld [vmem:[%s829_s3 + $0xf0] sm:$0xff]  ;;  %v307_v14 = vld [vmem:[%s829_s3 + $0x68] sm:$0xff]  ;;  %s219_s14 = scalar_lea.vmem %s826_s0, %s451_s8  ;;  %p517_p11 = scmp.ne.s32.totalorder %s515_s26, %s516_s30 }
  0x18   : > { %263 = vmatpush.msra.mxu0 %v229_v4  ;;  %283 = vmatpush.msra.mxu1 %v230_v5  ;;  %v323_v15 = vld [vmem:[%s829_s3 + $0xe8] sm:$0xff]  ;;  %v223_v16 = vld [vmem:[%s827_s1 + $0x10] sm:$0xff]  ;;  %v224_v17 = vld [vmem:[%s827_s1 + $0x18] sm:$0xff]  ;;  %p522_p1 = scmp.lt.s32.totalorder %s520_s7, %s516_s30 }
  0x19   : > { %350 = vmatpush.msra.mxu3 %v325_v10  ;;  %331 = vmatpush.msra.mxu2 %v308_v9  ;;  %v306_v18 = vld [vmem:[%s829_s3 + $0x60] sm:$0xff]  ;;  %v222_v21 = vld [vmem:[%s827_s1 + $0x8] sm:$0xff]  ;;  %v305_v23 = vld [vmem:[%s829_s3 + $0x58] sm:$0xff]  ;;  %p518_p12 = pnand %p517_p11, %p632_p5 }
  0x1a   : > { %264 = vmatpush.msra.mxu0 %v227_v6  ;;  %284 = vmatpush.msra.mxu1 %v228_v7  ;;  %v322_v19 = vld [vmem:[%s829_s3 + $0xe0] sm:$0xff]  ;;  %v321_v24 = vld [vmem:[%s829_s3 + $0xd8] sm:$0xff]  ;;  %v304_v25 = vld [vmem:[%s829_s3 + $0x50] sm:$0xff]  ;;  %p523_p2 = por %p522_p1, %p521_p0 }
  0x1b   : > { %351 = vmatpush.msra.mxu3 %v324_v13  ;;  %v221_v20 = vld [vmem:[%s827_s1] sm:$0xff]  ;;  %332 = vmatpush.msra.mxu2 %v307_v14  ;;  %v320_v26 = vld [vmem:[%s829_s3 + $0xd0] sm:$0xff]  ;;  %v303_v27 = vld [vmem:[%s829_s3 + $0x48] sm:$0xff]  ;;  %p519_p13 = pneg %p518_p12 }
  0x1c   : > { %265 = vmatpush.msra.mxu0 %v225_v11  ;;  %285 = vmatpush.msra.mxu1 %v226_v12  ;;  %v220_v22 = vld [vmem:[%s219_s14] sm:$0xff]  ;;  %v319_v28 = vld [vmem:[%s829_s3 + $0xc8] sm:$0xff]  ;;  %v301_v31 = vld [vmem:[%s829_s3 + $0x38] sm:$0xff] }
  0x1d   : > { %352 = vmatpush.msra.mxu3 %v323_v15  ;;  %333 = vmatpush.msra.mxu2 %v306_v18  ;;  %v302_v29 = vld [vmem:[%s829_s3 + $0x40] sm:$0xff]  ;;  %v317_v32 = vld [vmem:[%s829_s3 + $0xb8] sm:$0xff]  ;;  %v300_v33 = vld [vmem:[%s829_s3 + $0x30] sm:$0xff]  ;;  %p524_p3 = pnand %p523_p2, %p519_p13 }
  0x1e   : > { %266 = vmatpush.msra.mxu0 %v223_v16  ;;  %286 = vmatpush.msra.mxu1 %v224_v17  ;;  %v318_v30 = vld [vmem:[%s829_s3 + $0xc0] sm:$0xff]  ;;  %v316_v34 = vld [vmem:[%s829_s3 + $0xb0] sm:$0xff]  ;;  %v299_v35 = vld [vmem:[%s829_s3 + $0x28] sm:$0xff] }
  0x1f   : > { %353 = vmatpush.msra.mxu3 %v322_v19  ;;  %334 = vmatpush.msra.mxu2 %v305_v23  ;;  %v315_v36 = vld [vmem:[%s829_s3 + $0xa8] sm:$0xff]  ;;  %v298_v37 = vld [vmem:[%s829_s3 + $0x20] sm:$0xff]  ;;  %v297_v39 = vld [vmem:[%s829_s3 + $0x18] sm:$0xff] }
  0x20   : > { %267 = vmatpush.msra.mxu0 %v221_v20  ;;  %287 = vmatpush.msra.mxu1 %v222_v21  ;;  %v314_v38 = vld [vmem:[%s829_s3 + $0xa0] sm:$0xff]  ;;  %v296_v40 = vld [vmem:[%s829_s3 + $0x10] sm:$0xff]  ;;  %v313_v41 = vld [vmem:[%s829_s3 + $0x98] sm:$0xff] }
  0x21   : > { %453 = vmatmul.msk.f32.vlgmr.msra.gmra.mxu0 %vm241_vm1, %v220_v22  ;;  %455 = vmatmul.msk.f32.vlgmr.msra.gmra.mxu1 %vm241_vm1, %v220_v22  ;;  %v295_v42 = vld [vmem:[%s829_s3 + $0x8] sm:$0xff]  ;;  %v312_v43 = vld [vmem:[%s829_s3 + $0x90] sm:$0xff]  ;;  %v294_v44 = vld [vmem:[%s829_s3] sm:$0xff] }
  0x22   : > { %354 = vmatpush.msra.mxu3 %v321_v24  ;;  %335 = vmatpush.msra.mxu2 %v304_v25  ;;  %v311_v45 = vld [vmem:[%s829_s3 + $0x88] sm:$0xff]  ;;  %v310_v46 = vld [vmem:[%s829_s3 + $0x80] sm:$0xff] }
  0x23   : > { %v235_v47 = vld [vmem:[%s828_s2] sm:$0x3] }
  0x24   : > { %355 = vmatpush.msra.mxu3 %v320_v26  ;;  %336 = vmatpush.msra.mxu2 %v303_v27  ;;  %v237_v48 = vperm.slane %v235_v47, 0  ;;  %v238_v49 = vperm.slane %v235_v47, 1  ;;  %v499_v56 = vld [vmem:[%s830_s4] ss:$0 sm:$0xff] }
  0x26   : > { %356 = vmatpush.msra.mxu3 %v319_v28  ;;  %337 = vmatpush.msra.mxu2 %v302_v29 }
  0x28   : > { %357 = vmatpush.msra.mxu3 %v318_v30  ;;  %338 = vmatpush.msra.mxu2 %v301_v31 }
  0x2a   : > { %358 = vmatpush.msra.mxu3 %v317_v32  ;;  %339 = vmatpush.msra.mxu2 %v300_v33 }
  0x2c   : > { %359 = vmatpush.msra.mxu3 %v316_v34  ;;  %340 = vmatpush.msra.mxu2 %v299_v35 }
  0x2e   : > { %360 = vmatpush.msra.mxu3 %v315_v36  ;;  %341 = vmatpush.msra.mxu2 %v298_v37 }
  0x30   : > { %361 = vmatpush.msra.mxu3 %v314_v38  ;;  %342 = vmatpush.msra.mxu2 %v297_v39 }
  0x32   : > { %343 = vmatpush.msra.mxu2 %v296_v40  ;;  %362 = vmatpush.msra.mxu3 %v313_v41 }
  0x34   : > { %344 = vmatpush.msra.mxu2 %v295_v42  ;;  %363 = vmatpush.msra.mxu3 %v312_v43 }
  0x36   : > { %345 = vmatpush.msra.mxu2 %v294_v44  ;;  %364 = vmatpush.msra.mxu3 %v311_v45 }
  0x38   : > { %365 = vmatpush.msra.mxu3 %v310_v46 }
  0x9e   : > { %v269_v50 = vpop.f32.mrf.mxu0  ;;  %v289_v51 = vpop.f32.mrf.mxu1 }
  0x9f   : > { %v270_v52 = vadd.f32 %v269_v50, %v237_v48  ;;  %v290_v53 = vadd.f32 %v289_v51, %v238_v49 }
  0xa1   : > { %v292_v54 = vmax.f32 %v270_v52, 0.0  ;;  %v293_v55 = vmax.f32 %v290_v53, 0.0 }
  0xa3   : > { %346 = vmatmul.f32.vlgmr.msra.gmra.mxu2 %v292_v54  ;;  %366 = vmatmul.f32.vlgmr.msra.gmra.mxu3 %v293_v55 }
 0x126   : > { %v347_v57 = vpop.f32.mrf.mxu2  ;;  %v367_v58 = vpop.f32.mrf.mxu3 }
 0x127   : > { %v348_v59 = vadd.f32 %v499_v56, %v347_v57 }
 0x129   : > { %v368_v60 = vadd.f32 %v367_v58, %v348_v59 }
 0x12b   : > { %370 = vst.msk [vmem:[%s215_s23] sm:$0xff] %vm241_vm1, %v368_v60 }
 0x12c   : > { %527 = shalt.err (!%p524_p3)
}
 0x12d   : > { %460 = dma.vmem_to_hbm [thread:$0]  (%p632_p5), %s385_s17, 128, %s387_s25, %s372_s22  }
 0x12e PF: > { %p466_p4 = scmp.ge.s32.totalorder %s562_s21, 2  ;;  %s398_s9 = sand.u32 1, %s550_s18  }
 0x12f   : > { %s399_s12 = scalar_lea.sflag [#allocation3], %s398_s9 }
 0x130   : > { %p463_p7 = pnand %p466_p4, %p636_p6 }
 0x132   : > { %p464_p8 = pneg %p463_p7 }
 0x134   : > { %545 = dma.done.wait (%p464_p8), %s399_s12, 128  }
 0x135   : > { %547 = vsyncadd (%p464_p8), %s399_s12, 4294967168  ;;  %p15_p9 = scmp.ge.s32.totalorder %s619_s24, 4   ;;  %s834_s18 = smov %s554_s19 }
 0x136   : > { %s835_s19 = smov %s558_s20  ;;  %s836_s20 = smov %s630_s27 }
 0x137   : > { %s837_s21 = smov %s619_s24  ;;  %17 = sbr.rel (!%p15_p9) target bundleno = 3 (0x3), region = 75 }
 0x13c   :  { %405 = vsyncpa [#allocation3], 1 }
 0x13d   :  { %407 = vsyncpa [#allocation3 + $0x1], 1 }

</bundles_post_ra>
